<compile_context>
chip_gen: v5e
topology: v5e:2x2
jax: 0.10.0
libtpu: 0.0.40
codegen_flags: <defaults>
</compile_context>

<pallas_src>
import jax
import jax.numpy as jnp
from jax.experimental import pallas as pl
from jax.experimental.pallas import tpu as pltpu


def _round_up(n, m):
    return ((n + m - 1) // m) * m


def _k_multiple():
    # v6e / v7x MXUs are 2x256x256 -> pad the contraction dim to 256;
    # v2..v5 generations use 128-deep MXUs -> 128 is enough (don't over-pad).
    try:
        kind = jax.devices()[0].device_kind.lower()
    except Exception:  # defensive: unknown backend
        kind = ""
    return 128 if any(t in kind for t in ("v2", "v3", "v4", "v5")) else 256


def _spec(block_shape, index_map, *, single_buffered=False):
    # Grid-invariant (VMEM-resident) operands do not need Pallas' default
    # double buffer; Buffered(1) halves their VMEM footprint.
    if single_buffered and hasattr(pl, "Buffered"):
        return pl.BlockSpec(block_shape, index_map,
                            pipeline_mode=pl.Buffered(1))
    return pl.BlockSpec(block_shape, index_map)


# ------------------------------- kernels -----------------------------------


def _matmul_bias_kernel(x_ref, w_ref, b_ref, o_ref, acc_ref):
    """One (i, j, k) grid step of  out = x @ W + b  (f32 accumulation)."""
    k = pl.program_id(2)

    @pl.when(k == 0)
    def _():
        acc_ref[...] = jnp.zeros_like(acc_ref)

    acc_ref[...] += jnp.dot(x_ref[...], w_ref[...],
                            preferred_element_type=jnp.float32)

    @pl.when(k == pl.num_programs(2) - 1)
    def _():
        o_ref[...] = (acc_ref[...] + b_ref[...]).astype(o_ref.dtype)


def _two_layer_kernel(x_ref, w1_ref, b1_ref, w2_ref, b2_ref, o_ref):
    """out = (x @ W1 + b1) @ W2 + b2 for one batch tile; weights resident."""
    h = jnp.dot(x_ref[...], w1_ref[...],
                preferred_element_type=jnp.float32) + b1_ref[...]
    o = jnp.dot(h.astype(w2_ref.dtype), w2_ref[...],
                preferred_element_type=jnp.float32) + b2_ref[...]
    o_ref[...] = o.astype(o_ref.dtype)


# ------------------------------- wrapper -----------------------------------


def make_perceptron_forward(w1, b1, w2, b2, *,
                            tile_rows=512, tile_n=512, tile_k=512,
                            compute_dtype=None,
                            max_resident_weight_bytes=8 * 1024 * 1024,
                            prefer_fused=None,
                            small_batch_xla_fallback=False):
    """Bind Perceptron weights once; return forward(x) = layer2(layer1(x)).

    w1: (In, H), b1: (H,), w2: (H, O), b2: (O,)  (pre-transposed Linear layout).
    All weight-only work (fusion, padding, casting) happens HERE, once.
    """
    In, H = w1.shape
    H2, O = w2.shape
    assert H2 == H and b1.shape == (H,) and b2.shape == (O,)

    cd = jnp.dtype(compute_dtype) if compute_dtype is not None else jnp.dtype(w1.dtype)
    kmult = _k_multiple()
    lane = 128
    row_mult = 16 if cd.itemsize < 4 else 8      # sublane packing for bf16

    # No nonlinearity between the layers -> they can be fused into one matmul:
    #   y = x @ (W1 @ W2) + (b1 @ W2 + b2).
    # The fusion matmul cost is paid once here; fuse only if the *per-call*
    # FLOPs do not grow:  2*B*In*O  <=  2*B*H*(In+O).
    fuse = prefer_fused if prefer_fused is not None else (In * O <= H * (In + O))

    def _batch_tiles(B):
        # Balanced tiles (worst-case padding < row_mult rows) and >=2 tiles
        # whenever B permits, so "parallel" can shard across v7x's two cores.
        n_b = max(pl.cdiv(B, tile_rows), 2 if B >= 2 * row_mult else 1)
        TB = _round_up(pl.cdiv(B, n_b), row_mult)
        return n_b, TB, n_b * TB

    def _vmem_limit(need_bytes):
        return int(min(max(1.5 * need_bytes, 32 * 1024 * 1024),
                       128 * 1024 * 1024))

    if fuse:
        # ---- one-time algebraic fusion (hoisted out of the per-call path) ----
        w_f32 = jnp.dot(w1.astype(jnp.float32), w2.astype(jnp.float32),
                        preferred_element_type=jnp.float32)
        b_f = (jnp.dot(b1.astype(jnp.float32), w2.astype(jnp.float32),
                       preferred_element_type=jnp.float32)
               + b2.astype(jnp.float32))

        K_base = _round_up(In, kmult)              # fill MXU contraction depth
        N_base = _round_up(max(O, lane), lane)     # lane-dense output stores

        if K_base * N_base * cd.itemsize <= max_resident_weight_bytes:
            TK, TN = K_base, N_base                # whole weight VMEM-resident
        else:
            TK, TN = min(tile_k, K_base), min(tile_n, N_base)
        K_pad, N_pad = _round_up(K_base, TK), _round_up(N_base, TN)
        n_j, n_k = N_pad // TN, K_pad // TK
        w_resident = (n_j == 1 and n_k == 1)

        w_f = jnp.pad(w_f32, ((0, K_pad - In), (0, N_pad - O))).astype(cd)
        b_f = jnp.pad(b_f, ((0, N_pad - O),)).reshape(1, N_pad)   # stays f32

        def forward(x):
            B, in_dim = x.shape
            assert in_dim == In
            out_dtype = x.dtype

            if small_batch_xla_fallback and B <= 64:
                # Overhead-bound tail: a plain XLA dot beats any pallas_call.
                return ((x @ w1 + b1) @ w2 + b2).astype(out_dtype)

            n_b, TB, B_pad = _batch_tiles(B)
            xp = x.astype(cd)
            if B_pad != B or K_pad != In:
                xp = jnp.pad(xp, ((0, B_pad - B), (0, K_pad - In)))

            out_isz = jnp.dtype(out_dtype).itemsize
            need = (2 * TB * TK * cd.itemsize                          # x tiles
                    + (1 if w_resident else 2) * TK * TN * cd.itemsize  # weight
                    + 2 * TN * 4                                       # bias
                    + 2 * TB * TN * out_isz                            # out tiles
                    + TB * TN * 4)                                     # f32 acc
            flops = 2 * B_pad * K_pad * N_pad
            bytes_accessed = (xp.size * cd.itemsize
                              + (1 if w_resident else n_b) * w_f.size * cd.itemsize
                              + b_f.size * 4
                              + B_pad * N_pad * out_isz)

            out = pl.pallas_call(
                _matmul_bias_kernel,
                out_shape=jax.ShapeDtypeStruct((B_pad, N_pad), out_dtype),
                grid_spec=pltpu.PrefetchScalarGridSpec(
                    num_scalar_prefetch=0,
                    grid=(n_b, n_j, n_k),
                    in_specs=[
                        pl.BlockSpec((TB, TK), lambda i, j, k: (i, k)),
                        _spec((TK, TN), lambda i, j, k: (k, j),
                              single_buffered=w_resident),
                        _spec((1, TN), lambda i, j, k: (0, j),
                              single_buffered=(n_j == 1)),
                    ],
                    out_specs=pl.BlockSpec((TB, TN), lambda i, j, k: (i, j)),
                    scratch_shapes=[pltpu.VMEM((TB, TN), jnp.float32)],
                ),
                compiler_params=pltpu.CompilerParams(
                    dimension_semantics=("parallel", "parallel", "arbitrary"),
                    vmem_limit_bytes=_vmem_limit(need)),
                cost_estimate=pl.CostEstimate(
                    flops=flops, transcendentals=0,
                    bytes_accessed=bytes_accessed),
            )(xp, w_f, b_f)
            return out[:B, :O]

        return forward

    # ---- unfused two-matmul path (chosen when In*O > H*(In+O)) ----
    # TODO(synk): add K/N tiling to this path too once W1/W2 no longer fit VMEM.
    K_pad = _round_up(In, kmult)
    H_pad = _round_up(max(H, lane), kmult)        # N of dot1 and K of dot2
    N_pad = _round_up(max(O, lane), lane)

    w1p = jnp.pad(w1, ((0, K_pad - In), (0, H_pad - H))).astype(cd)
    b1p = jnp.pad(b1.astype(jnp.float32), ((0, H_pad - H),)).reshape(1, H_pad)
    w2p = jnp.pad(w2, ((0, H_pad - H), (0, N_pad - O))).astype(cd)
    b2p = jnp.pad(b2.astype(jnp.float32), ((0, N_pad - O),)).reshape(1, N_pad)

    def forward(x):
        B, in_dim = x.shape
        assert in_dim == In
        out_dtype = x.dtype

        if small_batch_xla_fallback and B <= 64:
            return ((x @ w1 + b1) @ w2 + b2).astype(out_dtype)

        n_b, TB, B_pad = _batch_tiles(B)
        xp = x.astype(cd)
        if B_pad != B or K_pad != In:
            xp = jnp.pad(xp, ((0, B_pad - B), (0, K_pad - In)))

        out_isz = jnp.dtype(out_dtype).itemsize
        need = (2 * TB * K_pad * cd.itemsize
                + (w1p.size + w2p.size) * cd.itemsize
                + (b1p.size + b2p.size) * 4
                + TB * H_pad * 4                      # f32 hidden tile
                + 2 * TB * N_pad * out_isz)
        flops = 2 * B_pad * (K_pad * H_pad + H_pad * N_pad)
        bytes_accessed = (xp.size * cd.itemsize
                          + (w1p.size + w2p.size) * cd.itemsize
                          + (b1p.size + b2p.size) * 4
                          + B_pad * N_pad * out_isz)

        out = pl.pallas_call(
            _two_layer_kernel,
            out_shape=jax.ShapeDtypeStruct((B_pad, N_pad), out_dtype),
            grid_spec=pltpu.PrefetchScalarGridSpec(
                num_scalar_prefetch=0,
                grid=(n_b,),
                in_specs=[
                    pl.BlockSpec((TB, K_pad), lambda i: (i, 0)),
                    _spec((K_pad, H_pad), lambda i: (0, 0), single_buffered=True),
                    _spec((1, H_pad), lambda i: (0, 0), single_buffered=True),
                    _spec((H_pad, N_pad), lambda i: (0, 0), single_buffered=True),
                    _spec((1, N_pad), lambda i: (0, 0), single_buffered=True),
                ],
                out_specs=pl.BlockSpec((TB, N_pad), lambda i: (i, 0)),
            ),
            compiler_params=pltpu.CompilerParams(
                dimension_semantics=("parallel",),
                vmem_limit_bytes=_vmem_limit(need)),
            cost_estimate=pl.CostEstimate(
                flops=flops, transcendentals=0, bytes_accessed=bytes_accessed),
        )(xp, w1p, b1p, w2p, b2p)
        return out[:B, :O]

    return forward


# --------------------------------- test -------------------------------------


if __name__ == "__main__":
    key = jax.random.PRNGKey(0)

    def init(k, In, H, O):
        kw1, kb1, kw2, kb2 = jax.random.split(k, 4)
        lim1, lim2 = 1.0 / In ** 0.5, 1.0 / H ** 0.5   # nn.Linear default init
        w1 = jax.random.uniform(kw1, (In, H), minval=-lim1, maxval=lim1, dtype=jnp.float32)
        b1 = jax.random.uniform(kb1, (H,), minval=-lim1, maxval=lim1, dtype=jnp.float32)
        w2 = jax.random.uniform(kw2, (H, O), minval=-lim2, maxval=lim2, dtype=jnp.float32)
        b2 = jax.random.uniform(kb2, (O,), minval=-lim2, maxval=lim2, dtype=jnp.float32)
        return w1, b1, w2, b2

    def ref_fwd(x, w1, b1, w2, b2):
        return (x @ w1 + b1) @ w2 + b2

    k1, k2, k3, kx1, kx2, kx3 = jax.random.split(key, 6)

    # 1) Toy shapes from the module (num_inputs=32, num_hiddens=64,
    #    num_outputs=16, batch=8): fused path, weight VMEM-resident and
    #    single-buffered, f32 compute.
    B, In, H, O = 8, 32, 64, 16
    w1, b1, w2, b2 = init(k1, In, H, O)
    x = jax.random.normal(kx1, (B, In), dtype=jnp.float32)
    fwd = make_perceptron_forward(w1, b1, w2, b2)
    out = jax.block_until_ready(fwd(x))
    assert out.shape == (B, O)
    assert jnp.allclose(out, ref_fwd(x, w1, b1, w2, b2), atol=1e-4, rtol=1e-4)

    # 2) Fused + (N, K)-tiled accumulator path in bf16 (forced), uneven batch.
    B, In, H, O = 300, 512, 128, 384
    w1, b1, w2, b2 = init(k2, In, H, O)
    x = jax.random.normal(kx2, (B, In), dtype=jnp.float32)
    fwd = make_perceptron_forward(
        w1, b1, w2, b2, compute_dtype=jnp.bfloat16, prefer_fused=True,
        max_resident_weight_bytes=0, tile_k=256, tile_n=128)
    out = jax.block_until_ready(fwd(x))
    assert out.shape == (B, O)
    assert jnp.allclose(out, ref_fwd(x, w1, b1, w2, b2), atol=2e-2, rtol=2e-2)

    # 3) Unfused two-matmul path (auto-selected: In*O > H*(In+O)), f32.
    B, In, H, O = 40, 128, 16, 128
    w1, b1, w2, b2 = init(k3, In, H, O)
    x = jax.random.normal(kx3, (B, In), dtype=jnp.float32)
    fwd = make_perceptron_forward(w1, b1, w2, b2)
    out = jax.block_until_ready(fwd(x))
    assert out.shape == (B, O)
    assert jnp.allclose(out, ref_fwd(x, w1, b1, w2, b2), atol=1e-4, rtol=1e-4)

    print("KERNEL_OK")
</pallas_src>

<mosaic_0001>
module attributes {stable_mosaic.version = 11 : i64} {
  func.func @_matmul_bias_kernel(%arg0: i32, %arg1: i32, %arg2: i32, %arg3: memref<8x256xf32, #tpu.memory_space<vmem>>, %arg4: memref<256x128xf32, #tpu.memory_space<vmem>>, %arg5: memref<1x128xf32, #tpu.memory_space<vmem>>, %arg6: memref<8x128xf32, #tpu.memory_space<vmem>>, %arg7: memref<8x128xf32, #tpu.memory_space<vmem>>) attributes {dimension_semantics = [#tpu.dimension_semantics<parallel>, #tpu.dimension_semantics<parallel>, #tpu.dimension_semantics<arbitrary>], iteration_bounds = array<i64: 1, 1, 1>, scalar_prefetch = 0 : i64, scratch_operands = 1 : i64, tpu.core_type = #tpu.core_type<tc>, window_params = [{transform_indices = @transform_0, window_bounds = array<i64: 8, 256>}, {pipeline_mode = #tpu.pipeline_mode<synchronous>, transform_indices = @transform_1, window_bounds = array<i64: 256, 128>}, {pipeline_mode = #tpu.pipeline_mode<synchronous>, transform_indices = @transform_2, window_bounds = array<i64: 1, 128>}, {transform_indices = @transform_3, window_bounds = array<i64: 8, 128>}]} {
    %c0_i32 = arith.constant 0 : i32
    %0 = arith.cmpi eq, %arg2, %c0_i32 : i32
    %1 = arith.extui %0 : i1 to i32
    %c0_i32_0 = arith.constant 0 : i32
    %2 = arith.cmpi ne, %1, %c0_i32_0 : i32
    scf.if %2 {
      %cst_10 = arith.constant 0.000000e+00 : f32
      %12 = vector.broadcast %cst_10 : f32 to vector<8x128xf32>
      %c0_11 = arith.constant 0 : index
      %c0_12 = arith.constant 0 : index
      %13 = vector.load %arg7[%c0_11, %c0_12] : memref<8x128xf32, #tpu.memory_space<vmem>>, vector<8x128xf32>
      tpu.vector_store %arg7[%c0_11, %c0_12], %12 {strides = array<i32>} : memref<8x128xf32, #tpu.memory_space<vmem>>, vector<8x128xf32>,
    } else {
    }
    %c0 = arith.constant 0 : index
    %c0_1 = arith.constant 0 : index
    %3 = vector.load %arg7[%c0, %c0_1] : memref<8x128xf32, #tpu.memory_space<vmem>>, vector<8x128xf32>
    %c0_2 = arith.constant 0 : index
    %c0_3 = arith.constant 0 : index
    %4 = vector.load %arg3[%c0_2, %c0_3] : memref<8x256xf32, #tpu.memory_space<vmem>>, vector<8x256xf32>
    %c0_4 = arith.constant 0 : index
    %c0_5 = arith.constant 0 : index
    %5 = vector.load %arg4[%c0_4, %c0_5] : memref<256x128xf32, #tpu.memory_space<vmem>>, vector<256x128xf32>
    %cst = arith.constant dense<0.000000e+00> : vector<8x128xf32>
    %6 = tpu.matmul %4, %5, %cst {dimension_numbers = #tpu.dot_dimension_numbers<[1], [0], [0], [1], [0, 0, 1, 1], [], []>} : vector<8x256xf32>, vector<256x128xf32>, vector<8x128xf32> -> vector<8x128xf32>
    %7 = arith.addf %3, %6 : vector<8x128xf32>
    %c0_6 = arith.constant 0 : index
    %c0_7 = arith.constant 0 : index
    %8 = vector.load %arg7[%c0_6, %c0_7] : memref<8x128xf32, #tpu.memory_space<vmem>>, vector<8x128xf32>
    tpu.vector_store %arg7[%c0_6, %c0_7], %7 {strides = array<i32>} : memref<8x128xf32, #tpu.memory_space<vmem>>, vector<8x128xf32>,
    %c0_i32_8 = arith.constant 0 : i32
    %9 = arith.cmpi eq, %arg2, %c0_i32_8 : i32
    %10 = arith.extui %9 : i1 to i32
    %c0_i32_9 = arith.constant 0 : i32
    %11 = arith.cmpi ne, %10, %c0_i32_9 : i32
    scf.if %11 {
      %c0_10 = arith.constant 0 : index
      %c0_11 = arith.constant 0 : index
      %12 = vector.load %arg7[%c0_10, %c0_11] : memref<8x128xf32, #tpu.memory_space<vmem>>, vector<8x128xf32>
      %c0_12 = arith.constant 0 : index
      %c0_13 = arith.constant 0 : index
      %13 = vector.load %arg5[%c0_12, %c0_13] : memref<1x128xf32, #tpu.memory_space<vmem>>, vector<1x128xf32>
      %14 = vector.broadcast %13 : vector<1x128xf32> to vector<8x128xf32>
      %15 = arith.addf %12, %14 : vector<8x128xf32>
      %c0_14 = arith.constant 0 : index
      %c0_15 = arith.constant 0 : index
      %16 = vector.load %arg6[%c0_14, %c0_15] : memref<8x128xf32, #tpu.memory_space<vmem>>, vector<8x128xf32>
      tpu.vector_store %arg6[%c0_14, %c0_15], %15 {strides = array<i32>} : memref<8x128xf32, #tpu.memory_space<vmem>>, vector<8x128xf32>,
    } else {
    }
    return
  }
  func.func @transform_0(%arg0: i32, %arg1: i32, %arg2: i32) -> (i32, i32) {
    %c0_i32 = arith.constant 0 : i32
    return %arg0, %arg2 : i32, i32
  }
  func.func @transform_1(%arg0: i32, %arg1: i32, %arg2: i32) -> (i32, i32) {
    %c0_i32 = arith.constant 0 : i32
    return %arg2, %arg1 : i32, i32
  }
  func.func @transform_2(%arg0: i32, %arg1: i32, %arg2: i32) -> (i32, i32) {
    %c0_i32 = arith.constant 0 : i32
    %c0_i32_0 = arith.constant 0 : i32
    return %c0_i32, %arg1 : i32, i32
  }
  func.func @transform_3(%arg0: i32, %arg1: i32, %arg2: i32) -> (i32, i32) {
    %c0_i32 = arith.constant 0 : i32
    return %arg0, %arg1 : i32, i32
  }
}

</mosaic_0001>

<bundles_post_ra>
// kernel: tpu_custom_call.1
= control target key start
LH: loop header
LB: loop body
LE: loop exit
PB: predicated region body
PF: predicated region fallthrough
CT: control target
= control target key end

     0   :  { %8 = vsyncpa [#allocation4], 0  ;;  %s276_s0 = inlined_call_operand.hbm [shape: f32[8,256], index: 0, kind: input, shape index: {}]   ;;  %s277_s1 = inlined_call_operand.hbm [shape: f32[256,128], index: 1, kind: input, shape index: {}]   ;;  %s278_s2 = inlined_call_operand.vmem [shape: f32[1,128], index: 2, kind: input, shape index: {}]   ;;  %s279_s3 = inlined_call_operand.hbm [shape: f32[8,128], index: 3, kind: output, shape index: {}]  }
   0x1   :  { %9 = vsyncpa [#allocation7], 0 }
   0x2   :  { %10 = vsyncpa [#allocation5], 0  ;;  %s16_s14 = sshll.u32 %s276_s0, 4  ;;  %s239_s15 = smov [#allocation3]   ;;  %s17_s14 = int_to_ptr.hbm [resolvable:$true] %s16_s14 }
   0x3   :  { %s18_s16 = sshll.u32 %s239_s15, 4  ;;  %s26_s19 = sshll.u32 %s277_s1, 4  ;;  %s19_s16 = int_to_ptr.vmem [resolvable:$true] %s18_s16  ;;  %s27_s19 = int_to_ptr.hbm [resolvable:$true] %s26_s19 }
   0x4   :  { %21 = dma.hbm_to_vmem [thread:$0]  %s17_s14, 256, %s19_s16, [#allocation4]  }
   0x5   :  { %s240_s20 = smov [#allocation6]   ;;  %s241_s22 = smov 128  }
   0x6   :  { %s28_s21 = sshll.u32 %s240_s20, 4  ;;  %s242_s23 = smov 8   ;;  %s29_s21 = int_to_ptr.vmem [resolvable:$true] %s28_s21 }
   0x7   :  { %34 = dma.hbm_to_vmem [thread:$0]  %s27_s19, 4096, %s29_s21, [#allocation7], %s241_s22, %s241_s22, %s242_s23  }
   0x8   :  { %233 = dma.done.wait [#allocation4], 256  }
   0x9   :  { %234 = vsyncadd [#allocation4], 4294967040 }
   0xa   :  { %235 = dma.done.wait [#allocation7], 4096  }
   0xb   :  { %236 = vsyncadd [#allocation7], 4294963200  ;;  %v68_v0 = vld [vmem:[#allocation6 + $0x78] sm:$0xff]  ;;  %v67_v2 = vld [vmem:[#allocation6 + $0x70] sm:$0xff]  ;;  %s243_s24 = smov [#allocation8]   ;;  %s144_s28 = sshll.u32 %s279_s3, 4  ;;  %s145_s28 = int_to_ptr.hbm [resolvable:$true] %s144_s28 }
   0xc   :  { %v84_v1 = vld [vmem:[#allocation6 + $0xf8] sm:$0xff]  ;;  %85 = vmatpush.msra.mxu0 %v68_v0  ;;  %v83_v3 = vld [vmem:[#allocation6 + $0xf0] sm:$0xff]  ;;  %v66_v4 = vld [vmem:[#allocation6 + $0x68] sm:$0xff]  ;;  %s142_s25 = sshll.u32 %s243_s24, 4  ;;  %s143_s25 = int_to_ptr.vmem [resolvable:$true] %s142_s25 }
   0xd   :  { %105 = vmatpush.msra.mxu1 %v84_v1  ;;  %v82_v5 = vld [vmem:[#allocation6 + $0xe8] sm:$0xff]  ;;  %v65_v6 = vld [vmem:[#allocation6 + $0x60] sm:$0xff]  ;;  %v64_v8 = vld [vmem:[#allocation6 + $0x58] sm:$0xff] }
   0xe   :  { %86 = vmatpush.msra.mxu0 %v67_v2  ;;  %v81_v7 = vld [vmem:[#allocation6 + $0xe0] sm:$0xff]  ;;  %v80_v9 = vld [vmem:[#allocation6 + $0xd8] sm:$0xff]  ;;  %v63_v10 = vld [vmem:[#allocation6 + $0x50] sm:$0xff] }
   0xf   :  { %106 = vmatpush.msra.mxu1 %v83_v3  ;;  %v79_v11 = vld [vmem:[#allocation6 + $0xd0] sm:$0xff]  ;;  %v62_v12 = vld [vmem:[#allocation6 + $0x48] sm:$0xff]  ;;  %v61_v14 = vld [vmem:[#allocation6 + $0x40] sm:$0xff] }
  0x10   :  { %87 = vmatpush.msra.mxu0 %v66_v4  ;;  %v78_v13 = vld [vmem:[#allocation6 + $0xc8] sm:$0xff]  ;;  %v77_v15 = vld [vmem:[#allocation6 + $0xc0] sm:$0xff]  ;;  %v60_v16 = vld [vmem:[#allocation6 + $0x38] sm:$0xff] }
  0x11   :  { %107 = vmatpush.msra.mxu1 %v82_v5  ;;  %v76_v17 = vld [vmem:[#allocation6 + $0xb8] sm:$0xff]  ;;  %v59_v18 = vld [vmem:[#allocation6 + $0x30] sm:$0xff]  ;;  %v58_v20 = vld [vmem:[#allocation6 + $0x28] sm:$0xff] }
  0x12   :  { %88 = vmatpush.msra.mxu0 %v65_v6  ;;  %v75_v19 = vld [vmem:[#allocation6 + $0xb0] sm:$0xff]  ;;  %v74_v21 = vld [vmem:[#allocation6 + $0xa8] sm:$0xff]  ;;  %v57_v22 = vld [vmem:[#allocation6 + $0x20] sm:$0xff] }
  0x13   :  { %108 = vmatpush.msra.mxu1 %v81_v7  ;;  %v73_v23 = vld [vmem:[#allocation6 + $0xa0] sm:$0xff]  ;;  %v56_v24 = vld [vmem:[#allocation6 + $0x18] sm:$0xff]  ;;  %v55_v26 = vld [vmem:[#allocation6 + $0x10] sm:$0xff] }
  0x14   :  { %89 = vmatpush.msra.mxu0 %v64_v8  ;;  %v72_v25 = vld [vmem:[#allocation6 + $0x98] sm:$0xff]  ;;  %v71_v27 = vld [vmem:[#allocation6 + $0x90] sm:$0xff]  ;;  %v54_v28 = vld [vmem:[#allocation6 + $0x8] sm:$0xff] }
  0x15   :  { %109 = vmatpush.msra.mxu1 %v80_v9  ;;  %v70_v29 = vld [vmem:[#allocation6 + $0x88] sm:$0xff]  ;;  %v53_v30 = vld [vmem:[#allocation6] sm:$0xff]  ;;  %v51_v32 = vld [vmem:[#allocation3] sm:$0xff] }
  0x16   :  { %90 = vmatpush.msra.mxu0 %v63_v10  ;;  %v69_v31 = vld [vmem:[#allocation6 + $0x80] sm:$0xff]  ;;  %v52_v33 = vld [vmem:[#allocation3 + $0x8] sm:$0xff]  ;;  %v160_v34 = vld [vmem:[%s278_s2] ss:$0 sm:$0xff] }
  0x17   :  { %110 = vmatpush.msra.mxu1 %v79_v11 }
  0x18   :  { %91 = vmatpush.msra.mxu0 %v62_v12 }
  0x19   :  { %111 = vmatpush.msra.mxu1 %v78_v13 }
  0x1a   :  { %92 = vmatpush.msra.mxu0 %v61_v14 }
  0x1b   :  { %112 = vmatpush.msra.mxu1 %v77_v15 }
  0x1c   :  { %93 = vmatpush.msra.mxu0 %v60_v16 }
  0x1d   :  { %113 = vmatpush.msra.mxu1 %v76_v17 }
  0x1e   :  { %94 = vmatpush.msra.mxu0 %v59_v18 }
  0x1f   :  { %114 = vmatpush.msra.mxu1 %v75_v19 }
  0x20   :  { %95 = vmatpush.msra.mxu0 %v58_v20 }
  0x21   :  { %115 = vmatpush.msra.mxu1 %v74_v21 }
  0x22   :  { %96 = vmatpush.msra.mxu0 %v57_v22 }
  0x23   :  { %116 = vmatpush.msra.mxu1 %v73_v23 }
  0x24   :  { %97 = vmatpush.msra.mxu0 %v56_v24 }
  0x25   :  { %117 = vmatpush.msra.mxu1 %v72_v25 }
  0x26   :  { %98 = vmatpush.msra.mxu0 %v55_v26 }
  0x27   :  { %118 = vmatpush.msra.mxu1 %v71_v27 }
  0x28   :  { %99 = vmatpush.msra.mxu0 %v54_v28 }
  0x29   :  { %119 = vmatpush.msra.mxu1 %v70_v29 }
  0x2a   :  { %100 = vmatpush.msra.mxu0 %v53_v30 }
  0x2b   :  { %120 = vmatpush.msra.mxu1 %v69_v31  ;;  %101 = vmatmul.f32.vlgmr.msra.gmra.mxu0 %v51_v32 }
  0x2c   :  { %121 = vmatmul.f32.vlgmr.msra.gmra.mxu1 %v52_v33 }
  0xa8   :  { %v102_v35 = vpop.f32.mrf.mxu0 }
  0xa9   :  { %v122_v36 = vpop.f32.mrf.mxu1 }
  0xaa   :  { %v123_v37 = vadd.f32 %v122_v36, %v102_v35 }
  0xac   :  { %v135_v38 = vadd.f32 %v160_v34, %v123_v37 }
  0xae   :  { %136 = vst [vmem:[#allocation8] sm:$0xff] %v135_v38 }
  0xaf   :  { %147 = dma.vmem_to_hbm [thread:$0]  %s143_s25, 128, %s145_s28, [#allocation5]  }
  0xb0   :  { %237 = dma.done.wait [#allocation5], 128  }
  0xb1   :  { %238 = vsyncadd [#allocation5], 4294967168 }
  0xb2   :  { %152 = vsyncpa [#allocation4], 1 }
  0xb3   :  { %153 = vsyncpa [#allocation7], 1 }
  0xb4   :  { %154 = vsyncpa [#allocation5], 1 }

</bundles_post_ra>
